<compile_context>
chip_gen: v5e
topology: v5e:2x2
jax: 0.10.0
libtpu: 0.0.40
codegen_flags: <defaults>
</compile_context>

<pallas_src>
import functools

import jax
import jax.numpy as jnp
from jax.experimental import pallas as pl
from jax.experimental.pallas import tpu as pltpu

# Deterministic synthetic "tokenizer" special ids.
UNK_ID = 3
CLS_ID = 0
EOS_ID = 2


def bow_lse_kernel(h_ref, wemb_ref, lse_ref, m_s, l_s, *, vocab_size):
    """Online logsumexp over the vocab axis of logits = h @ Wemb^T."""
    v = pl.program_id(1)
    nv = pl.num_programs(1)
    tv = wemb_ref.shape[0]

    @pl.when(v == 0)
    def _init():
        m_s[...] = jnp.full(m_s.shape, -jnp.inf, dtype=jnp.float32)
        l_s[...] = jnp.zeros(l_s.shape, dtype=jnp.float32)

    # (tb, tv) logits tile: bf16 x bf16 on the MXU, f32 accumulation.
    logits = jax.lax.dot_general(
        h_ref[...], wemb_ref[...],
        dimension_numbers=(((1,), (1,)), ((), ())),
        preferred_element_type=jnp.float32)

    def online_update(tile_logits):
        m_prev = m_s[...]
        m_new = jnp.maximum(m_prev,
                            jnp.max(tile_logits, axis=-1, keepdims=True))
        l_s[...] = (l_s[...] * jnp.exp(m_prev - m_new)
                    + jnp.sum(jnp.exp(tile_logits - m_new), axis=-1,
                              keepdims=True))
        m_s[...] = m_new

    if vocab_size % tv == 0:
        # No padded lanes anywhere: plain update on every step (no iota/
        # compare/select VPU passes in the hot loop).
        online_update(logits)
    else:
        # Only the last vocab tile can contain padded lanes.
        @pl.when(v < nv - 1)
        def _update_full():
            online_update(logits)

        @pl.when(v == nv - 1)
        def _update_masked():
            col = jax.lax.broadcasted_iota(jnp.int32, logits.shape, 1)
            valid = (v * tv + col) < vocab_size
            online_update(jnp.where(valid, logits, -jnp.inf))

    @pl.when(v == nv - 1)
    def _finalize():
        lse_ref[...] = m_s[...] + jnp.log(l_s[...])


def _pick_tb(batch, target=256):
    """Batch tile: divides B, multiple of 8 (or == B); prefers >= 2 tiles
    so v7x's second TensorCore has work."""
    if batch <= target:
        half = batch // 2
        if batch % 2 == 0 and half >= 64 and half % 8 == 0:
            return half
        return batch
    t = target - (target % 8)
    while t >= 8:
        if batch % t == 0:
            return t
        t -= 8
    return batch


def _pick_tv(vocab, embed_dim, target=1024):
    """Vocab tile: multiple of 8; embed double-buffer capped to ~8 MiB."""
    cap = max(8, (8 << 20) // max(1, 4 * embed_dim))
    t = min(target, cap, vocab)
    if t == vocab:
        return vocab
    return max(8, t - (t % 8))


def streamed_logsumexp(h_bf16, wemb_bf16, *, tb=None, tv=None):
    """Row-wise logsumexp of (h @ wemb^T), vocab axis streamed over the grid."""
    B, E = h_bf16.shape
    V = wemb_bf16.shape[0]

    tb = _pick_tb(B) if tb is None else tb
    tv = _pick_tv(V, E) if tv is None else min(tv, V)
    assert B % tb == 0 and (tb == B or tb % 8 == 0), (B, tb)
    assert tv == V or tv % 8 == 0, (V, tv)

    nb = B // tb
    nv = pl.cdiv(V, tv)

    # VMEM budget: embed-tile double-buffer + h double-buffer + logits/vreg
    # headroom.  Kept within v7x's 64 MiB; raises v5e's 16 MiB scoped default.
    vmem_est = 2 * tv * E * 2 + 2 * tb * E * 2 + tb * tv * 4 + (1 << 20)
    vmem_limit = min(max(32 << 20, int(1.25 * vmem_est)), 64 << 20)

    # TODO(synk): for B >> tb, a vocab-outer grid with persistent (B, E) h and
    # (B, 1) m/l scratch would stream the embedding table from HBM exactly once.
    grid_spec = pltpu.PrefetchScalarGridSpec(
        num_scalar_prefetch=0,
        grid=(nb, nv),
        in_specs=[
            pl.BlockSpec((tb, E), lambda b, v: (b, 0)),   # h (bf16), v-invariant
            pl.BlockSpec((tv, E), lambda b, v: (v, 0)),   # embed tile (bf16)
        ],
        out_specs=pl.BlockSpec((tb, 1), lambda b, v: (b, 0)),
        scratch_shapes=[
            pltpu.VMEM((tb, 1), jnp.float32),   # running max m
            pltpu.VMEM((tb, 1), jnp.float32),   # running sum l
        ],
    )

    return pl.pallas_call(
        functools.partial(bow_lse_kernel, vocab_size=V),
        out_shape=jax.ShapeDtypeStruct((B, 1), jnp.float32),
        grid_spec=grid_spec,
        compiler_params=pltpu.CompilerParams(
            dimension_semantics=("parallel", "arbitrary"),
            vmem_limit_bytes=vmem_limit),
    )(h_bf16, wemb_bf16)


def bow_loss(outs, w_proj, b_proj, embed_w, label, attention_mask,
             *, tb=None, tv=None):
    """outs: (B,E) f32, w_proj: (E,E), b_proj: (E,), embed_w: (V,E) tied
    weight, label: (B,L) int, attention_mask: (B,L) {0,1}."""
    label = label.astype(jnp.int32)

    # proj(outs) = outs @ Wproj^T + b  (tiny E x E matmul, XLA wrapper-side).
    # h is cast ONCE to bf16 so the streamed logits and the label-logit
    # correction share exactly the same precision.
    h = (outs.astype(jnp.float32) @ w_proj.astype(jnp.float32).T
         + b_proj.astype(jnp.float32))
    h_bf = h.astype(jnp.bfloat16)
    wemb_bf = embed_w.astype(jnp.bfloat16)

    # Dominant work: streamed logsumexp over the full vocab (Pallas kernel).
    lse = streamed_logsumexp(h_bf, wemb_bf, tb=tb, tv=tv)[:, 0]       # (B,)

    # Tiny label-logit correction, wrapper-side: <h, Wemb[label_l]> in bf16
    # with f32 accumulation (consistent with the kernel's logits).
    wlab = jnp.take(wemb_bf, label, axis=0)                           # (B,L,E)
    lab_logits = jnp.einsum('be,ble->bl', h_bf, wlab,
                            preferred_element_type=jnp.float32)       # (B,L)

    drop = ((label == UNK_ID) | (label == CLS_ID) | (label == EOS_ID)
            | (attention_mask == 0))
    keep = jnp.where(drop, 0.0, 1.0).astype(jnp.float32)              # (B,L)
    n_keep = jnp.sum(keep, axis=-1)                                   # (B,)

    # NLL: sum_l keep_l * (lse - logit[label_l]); sum over labels folded in,
    # mean over batch.
    row_loss = n_keep * lse - jnp.sum(keep * lab_logits, axis=-1)
    return jnp.mean(row_loss)


def reference_loss(outs, w_proj, b_proj, embed_w, label, attention_mask):
    h = outs @ w_proj.T + b_proj
    logits = h @ embed_w.T
    lprobs = jax.nn.log_softmax(logits, axis=-1)
    nll = -jnp.take_along_axis(lprobs, label, axis=-1)
    drop = ((label == UNK_ID) | (label == CLS_ID) |
            (label == EOS_ID) | (attention_mask == 0))
    nll = jnp.where(drop, 0.0, nll)
    return nll.sum(axis=-1).mean()


if __name__ == "__main__":
    B, L, E, V = 4, 8, 32, 1024

    key = jax.random.PRNGKey(0)
    k_outs, k_wp, k_emb, k_lab, k_attn = jax.random.split(key, 5)

    # Deterministic parameter init matching the module's reset_parameters.
    outs = jax.random.normal(k_outs, (B, E), dtype=jnp.float32)
    w_proj = 0.02 * jax.random.normal(k_wp, (E, E), dtype=jnp.float32)    # std=0.02
    b_proj = jnp.zeros((E,), dtype=jnp.float32)                           # constant 0
    embed_w = 0.02 * jax.random.normal(k_emb, (V, E), dtype=jnp.float32)  # tied weight
    label = jax.random.randint(k_lab, (B, L), 0, V, dtype=jnp.int32)
    attention_mask = jax.random.bernoulli(k_attn, 0.8, (B, L)).astype(jnp.int32)

    # Reference uses the same bf16-rounded embedding the kernel streams.
    embed_ref = embed_w.astype(jnp.bfloat16).astype(jnp.float32)
    ref = reference_loss(outs, w_proj, b_proj, embed_ref, label, attention_mask)

    # tv divides V: no padded vocab tile (hot-loop path only).
    loss = bow_loss(outs, w_proj, b_proj, embed_w, label, attention_mask, tv=256)
    loss = jax.block_until_ready(loss)
    assert jnp.allclose(loss, ref, rtol=2e-3, atol=2e-3), (loss, ref)

    # tv does NOT divide V: exercises the last-tile padded-lane mask branch.
    loss_pad = bow_loss(outs, w_proj, b_proj, embed_w, label, attention_mask, tv=192)
    loss_pad = jax.block_until_ready(loss_pad)
    assert jnp.allclose(loss_pad, ref, rtol=2e-3, atol=2e-3), (loss_pad, ref)

    print("KERNEL_OK")
</pallas_src>

<mosaic_0001>
module attributes {stable_mosaic.version = 11 : i64} {
  func.func @bow_lse_kernel(%arg0: i32, %arg1: i32, %arg2: memref<4x32xbf16, #tpu.memory_space<vmem>>, %arg3: memref<256x32xbf16, #tpu.memory_space<vmem>>, %arg4: memref<4x1xf32, #tpu.memory_space<vmem>>, %arg5: memref<4x1xf32, #tpu.memory_space<vmem>>, %arg6: memref<4x1xf32, #tpu.memory_space<vmem>>) attributes {dimension_semantics = [#tpu.dimension_semantics<parallel>, #tpu.dimension_semantics<arbitrary>], iteration_bounds = array<i64: 1, 4>, scalar_prefetch = 0 : i64, scratch_operands = 2 : i64, tpu.core_type = #tpu.core_type<tc>, window_params = [{transform_indices = @transform_0, window_bounds = array<i64: 4, 32>}, {transform_indices = @transform_1, window_bounds = array<i64: 256, 32>}, {transform_indices = @transform_2, window_bounds = array<i64: 4, 1>}]} {
    %c0_i32 = arith.constant 0 : i32
    %0 = arith.cmpi eq, %arg1, %c0_i32 : i32
    %1 = arith.extui %0 : i1 to i32
    %c0_i32_0 = arith.constant 0 : i32
    %2 = arith.cmpi ne, %1, %c0_i32_0 : i32
    scf.if %2 {
      %cst_15 = arith.constant 0xFF800000 : f32
      %25 = vector.broadcast %cst_15 : f32 to vector<4x1xf32>
      %c0_16 = arith.constant 0 : index
      %c0_17 = arith.constant 0 : index
      %26 = vector.load %arg5[%c0_16, %c0_17] : memref<4x1xf32, #tpu.memory_space<vmem>>, vector<4x1xf32>
      tpu.vector_store %arg5[%c0_16, %c0_17], %25 {strides = array<i32>} : memref<4x1xf32, #tpu.memory_space<vmem>>, vector<4x1xf32>,
      %cst_18 = arith.constant 0.000000e+00 : f32
      %27 = vector.broadcast %cst_18 : f32 to vector<4x1xf32>
      %c0_19 = arith.constant 0 : index
      %c0_20 = arith.constant 0 : index
      %28 = vector.load %arg6[%c0_19, %c0_20] : memref<4x1xf32, #tpu.memory_space<vmem>>, vector<4x1xf32>
      tpu.vector_store %arg6[%c0_19, %c0_20], %27 {strides = array<i32>} : memref<4x1xf32, #tpu.memory_space<vmem>>, vector<4x1xf32>,
    } else {
    }
    %c0 = arith.constant 0 : index
    %c0_1 = arith.constant 0 : index
    %3 = vector.load %arg2[%c0, %c0_1] : memref<4x32xbf16, #tpu.memory_space<vmem>>, vector<4x32xbf16>
    %c0_2 = arith.constant 0 : index
    %c0_3 = arith.constant 0 : index
    %4 = vector.load %arg3[%c0_2, %c0_3] : memref<256x32xbf16, #tpu.memory_space<vmem>>, vector<256x32xbf16>
    %cst = arith.constant dense<0.000000e+00> : vector<4x256xf32>
    %5 = tpu.matmul %3, %4, %cst {dimension_numbers = #tpu.dot_dimension_numbers<[1], [1], [0], [0], [0, 0, 1, 0], [], []>} : vector<4x32xbf16>, vector<256x32xbf16>, vector<4x256xf32> -> vector<4x256xf32>
    %c0_4 = arith.constant 0 : index
    %c0_5 = arith.constant 0 : index
    %6 = vector.load %arg5[%c0_4, %c0_5] : memref<4x1xf32, #tpu.memory_space<vmem>>, vector<4x1xf32>
    %cst_6 = arith.constant dense<0xFF800000> : vector<4xf32>
    %7 = vector.multi_reduction <maximumf>, %5, %cst_6 [1] : vector<4x256xf32> to vector<4xf32>
    %8 = vector.shape_cast %7 : vector<4xf32> to vector<4x1xf32>
    %9 = arith.maximumf %6, %8 : vector<4x1xf32>
    %c0_7 = arith.constant 0 : index
    %c0_8 = arith.constant 0 : index
    %10 = vector.load %arg6[%c0_7, %c0_8] : memref<4x1xf32, #tpu.memory_space<vmem>>, vector<4x1xf32>
    %11 = arith.subf %6, %9 : vector<4x1xf32>
    %12 = math.exp %11 : vector<4x1xf32>
    %13 = arith.mulf %10, %12 : vector<4x1xf32>
    %14 = vector.broadcast %9 : vector<4x1xf32> to vector<4x256xf32>
    %15 = arith.subf %5, %14 : vector<4x256xf32>
    %16 = math.exp %15 : vector<4x256xf32>
    %cst_9 = arith.constant dense<0.000000e+00> : vector<4xf32>
    %17 = vector.multi_reduction <add>, %16, %cst_9 [1] : vector<4x256xf32> to vector<4xf32>
    %18 = vector.shape_cast %17 : vector<4xf32> to vector<4x1xf32>
    %19 = arith.addf %13, %18 : vector<4x1xf32>
    %c0_10 = arith.constant 0 : index
    %c0_11 = arith.constant 0 : index
    %20 = vector.load %arg6[%c0_10, %c0_11] : memref<4x1xf32, #tpu.memory_space<vmem>>, vector<4x1xf32>
    tpu.vector_store %arg6[%c0_10, %c0_11], %19 {strides = array<i32>} : memref<4x1xf32, #tpu.memory_space<vmem>>, vector<4x1xf32>,
    %c0_12 = arith.constant 0 : index
    %c0_13 = arith.constant 0 : index
    %21 = vector.load %arg5[%c0_12, %c0_13] : memref<4x1xf32, #tpu.memory_space<vmem>>, vector<4x1xf32>
    tpu.vector_store %arg5[%c0_12, %c0_13], %9 {strides = array<i32>} : memref<4x1xf32, #tpu.memory_space<vmem>>, vector<4x1xf32>,
    %c3_i32 = arith.constant 3 : i32
    %22 = arith.cmpi eq, %arg1, %c3_i32 : i32
    %23 = arith.extui %22 : i1 to i32
    %c0_i32_14 = arith.constant 0 : i32
    %24 = arith.cmpi ne, %23, %c0_i32_14 : i32
    scf.if %24 {
      %c0_15 = arith.constant 0 : index
      %c0_16 = arith.constant 0 : index
      %25 = vector.load %arg5[%c0_15, %c0_16] : memref<4x1xf32, #tpu.memory_space<vmem>>, vector<4x1xf32>
      %c0_17 = arith.constant 0 : index
      %c0_18 = arith.constant 0 : index
      %26 = vector.load %arg6[%c0_17, %c0_18] : memref<4x1xf32, #tpu.memory_space<vmem>>, vector<4x1xf32>
      %27 = math.log %26 : vector<4x1xf32>
      %28 = arith.addf %25, %27 : vector<4x1xf32>
      %c0_19 = arith.constant 0 : index
      %c0_20 = arith.constant 0 : index
      %29 = vector.load %arg4[%c0_19, %c0_20] : memref<4x1xf32, #tpu.memory_space<vmem>>, vector<4x1xf32>
      tpu.vector_store %arg4[%c0_19, %c0_20], %28 {strides = array<i32>} : memref<4x1xf32, #tpu.memory_space<vmem>>, vector<4x1xf32>,
    } else {
    }
    return
  }
  func.func @transform_0(%arg0: i32, %arg1: i32) -> (i32, i32) {
    %c0_i32 = arith.constant 0 : i32
    %c0_i32_0 = arith.constant 0 : i32
    return %arg0, %c0_i32 : i32, i32
  }
  func.func @transform_1(%arg0: i32, %arg1: i32) -> (i32, i32) {
    %c0_i32 = arith.constant 0 : i32
    %c0_i32_0 = arith.constant 0 : i32
    return %arg1, %c0_i32 : i32, i32
  }
  func.func @transform_2(%arg0: i32, %arg1: i32) -> (i32, i32) {
    %c0_i32 = arith.constant 0 : i32
    %c0_i32_0 = arith.constant 0 : i32
    return %arg0, %c0_i32 : i32, i32
  }
}

</mosaic_0001>

<bundles_post_ra>
// kernel: tpu_custom_call.1
= control target key start
LH: loop header
LB: loop body
LE: loop exit
PB: predicated region body
PF: predicated region fallthrough
CT: control target
= control target key end

     0   :  { %s660_s9 = smov 0   ;;  %s662_s10 = smov 0   ;;  %s744_s0 = inlined_call_operand.vmem [shape: bf16[4,32], index: 0, kind: input, shape index: {}]   ;;  %s745_s1 = inlined_call_operand.vmem [shape: bf16[1024,32], index: 1, kind: input, shape index: {}]   ;;  %s746_s2 = inlined_call_operand.vmem [shape: f32[4,1], index: 2, kind: output, shape index: {}]  }
   0x1   :  { %s664_s11 = smov 0  }
   0x2 LB: > { %s21_s12 = sadd.s32 1, %s636_s10  ;;  %p492_p0 = scmp.ge.s32.totalorder %s640_s11, 1  ;;  %s640_s11 = sphi %s664_s11, %s12_s11   ;;  %s636_s10 = sphi %s662_s10, %s748_s10   ;;  %s632_s9 = sphi %s660_s9, %s747_s9  }
   0x3   : > { %p22_p1 = scmp.ge.s32.totalorder %s21_s12, 4  ;;  %p134_p2 = scmp.lt.s32.totalorder %s640_s11, 5 }
   0x5   : > { %s750_s12 = smov (%p22_p1, %s21_s12), 0  ;;  %p135_p3 = pnand %p492_p0, %p134_p2 }
   0x6   : > { %s493_s13 = sshll.u32 (!%p135_p3), %s632_s9, 5  ;;  %p495_p5 = scmp.ne.s32.totalorder (!%p135_p3), %s632_s9, 0 }
   0x7   : > { %138 = sbr.rel (%p135_p3) target bundleno = 601 (0x259), region = 28  ;;  %p164_p4 = scmp.lt.s32.totalorder (!%p135_p3), %s493_s13, 127 }
   0xc   : > { %s752_s13 = smov (!%p164_p4, %s493_s13), 127  ;;  %176 = sbr.rel (%p495_p5) target bundleno = 20 (0x14), region = 32 }
   0xd   : > { %s494_s14 = sshll.u32 %s752_s13, 2 }
   0xe   : > { %s684_s17 = scalar_lea.vmem %s745_s1, %s494_s14 }
  0x11   : > { %vm177_vm0 = vcmask 3072   ;;  %v642_v0 = vmov -inf   ;;  %v643_v1 = vmov 0.0  }
  0x12   : > { %178 = vst.msk [vmem:[#allocation2] sm:$0xf] %vm177_vm0, %v642_v0 }
  0x13   : > { %179 = vst.msk [vmem:[#allocation3] sm:$0xf] %vm177_vm0, %v643_v1 }
  0x14 PF: > { %v573_v2 = vld [vmem:[%s684_s17 + $0x38] sm:$0xff]  ;;  %vm293_vm1 = vcmask 261120   ;;  %v572_v6 = vld [vmem:[%s684_s17 + $0x30] sm:$0xff]  ;;  %v571_v10 = vld [vmem:[%s684_s17 + $0x28] sm:$0xff]  ;;  %vm372_vm2 = vcmask 1043456   ;;  %v644_v42 = vmov 0  }
  0x15   : > { %v581_v3 = vld [vmem:[%s684_s17 + $0x78] sm:$0xff]  ;;  %v319_v4 = vsel %vm293_vm1, %v573_v2, 0  ;;  %v580_v7 = vld [vmem:[%s684_s17 + $0x70] sm:$0xff]  ;;  %v316_v8 = vsel %vm293_vm1, %v572_v6, 0  ;;  %v579_v11 = vld [vmem:[%s684_s17 + $0x68] sm:$0xff]  ;;  %v313_v12 = vsel %vm293_vm1, %v571_v10, 0  ;;  %609 = vset.pattern.permute.xlu0 %v644_v42 }
  0x16   : > { %v343_v5 = vsel %vm293_vm1, %v581_v3, 0  ;;  %345 = vmatpush.bf16.xpose.msra.mxu0 %v319_v4  ;;  %v340_v9 = vsel %vm293_vm1, %v580_v7, 0  ;;  %v337_v13 = vsel %vm293_vm1, %v579_v11, 0  ;;  %v570_v14 = vld [vmem:[%s684_s17 + $0x20] sm:$0xff]  ;;  %v569_v18 = vld [vmem:[%s684_s17 + $0x18] sm:$0xff]  ;;  %v568_v22 = vld [vmem:[%s684_s17 + $0x10] sm:$0xff] }
  0x17   : > { %358 = vmatpush.bf16.xpose.msra.mxu1 %v343_v5  ;;  %v578_v15 = vld [vmem:[%s684_s17 + $0x60] sm:$0xff]  ;;  %v310_v16 = vsel %vm293_vm1, %v570_v14, 0  ;;  %v577_v19 = vld [vmem:[%s684_s17 + $0x58] sm:$0xff]  ;;  %v307_v20 = vsel %vm293_vm1, %v569_v18, 0  ;;  %v576_v23 = vld [vmem:[%s684_s17 + $0x50] sm:$0xff]  ;;  %v304_v24 = vsel %vm293_vm1, %v568_v22, 0 }
  0x18   : > { %v334_v17 = vsel %vm293_vm1, %v578_v15, 0  ;;  %v331_v21 = vsel %vm293_vm1, %v577_v19, 0  ;;  %v328_v25 = vsel %vm293_vm1, %v576_v23, 0  ;;  %v567_v26 = vld [vmem:[%s684_s17 + $0x8] sm:$0xff]  ;;  %v566_v30 = vld [vmem:[%s684_s17] sm:$0xff]  ;;  %vm401_vm3 = vcmask 3072  }
  0x19   : > { %v575_v27 = vld [vmem:[%s684_s17 + $0x48] sm:$0xff]  ;;  %v301_v28 = vsel %vm293_vm1, %v567_v26, 0  ;;  %v574_v31 = vld [vmem:[%s684_s17 + $0x40] sm:$0xff]  ;;  %v298_v32 = vsel %vm293_vm1, %v566_v30, 0  ;;  %p562_p6 = scmp.ne.s32.totalorder %s632_s9, 3 }
  0x1a   : > { %v325_v29 = vsel %vm293_vm1, %v575_v27, 0  ;;  %v322_v33 = vsel %vm293_vm1, %v574_v31, 0  ;;  %v180_v34 = vld [vmem:[%s744_s0] sm:$0x3]  ;;  %v379_v59 = vld [vmem:[#allocation3] sm:$0xf] }
  0x1b   : > { %v371_v43 = vld [vmem:[#allocation2] sm:$0xf] }
  0x1e   : > { %346 = vmatpush.bf16.xpose.msra.mxu0 %v316_v8 }
  0x1f   : > { %359 = vmatpush.bf16.xpose.msra.mxu1 %v340_v9 }
  0x26   : > { %347 = vmatpush.bf16.xpose.msra.mxu0 %v313_v12 }
  0x27   : > { %360 = vmatpush.bf16.xpose.msra.mxu1 %v337_v13 }
  0x2e   : > { %348 = vmatpush.bf16.xpose.msra.mxu0 %v310_v16 }
  0x2f   : > { %361 = vmatpush.bf16.xpose.msra.mxu1 %v334_v17 }
  0x36   : > { %349 = vmatpush.bf16.xpose.msra.mxu0 %v307_v20 }
  0x37   : > { %362 = vmatpush.bf16.xpose.msra.mxu1 %v331_v21 }
  0x3e   : > { %350 = vmatpush.bf16.xpose.msra.mxu0 %v304_v24 }
  0x3f   : > { %363 = vmatpush.bf16.xpose.msra.mxu1 %v328_v25 }
  0x46   : > { %351 = vmatpush.bf16.xpose.msra.mxu0 %v301_v28 }
  0x47   : > { %364 = vmatpush.bf16.xpose.msra.mxu1 %v325_v29 }
  0x4e   : > { %352 = vmatpush.bf16.xpose.msra.mxu0 %v298_v32 }
  0x4f   : > { %365 = vmatpush.bf16.xpose.msra.mxu1 %v322_v33 }
  0x55   : > { %560 = vmatmul.msk.bf16.vlgmr.msra.gmra.mxu0 %vm293_vm1, %v180_v34 }
  0x56   : > { %561 = vmatmul.msk.bf16.vlgmr.msra.gmra.mxu1 %vm293_vm1, %v180_v34 }
  0xd2   : > { %v354_v35 = vpop.f32.mrf.mxu0 }
  0xd3   : > { %v367_v36 = vpop.f32.mrf.mxu1  ;;  %v373_v37 = vsel %vm372_vm2, %v354_v35, -inf }
  0xd4   : > { %v374_v38 = vsel %vm372_vm2, %v367_v36, -inf }
  0xd5   : > { %v375_v39 = vmax.f32 %v373_v37, %v374_v38 }
  0xd7   : > { %376 = vmax.xlane.f32.xlu0 %v375_v39 }
  0xda   : > { %v356_v40 = vpop.f32.mrf.mxu0 }
  0xdb   : > { %v369_v41 = vpop.f32.mrf.mxu1 }
 0x14a   : > { %v377_v44 = vpop.xlane.xlu0 %376 }
 0x14b   : > { %v378_v45 = vmax.f32 %v371_v43, %v377_v44 }
 0x14d   : > { %v380_v46 = vsub.f32 %v371_v43, %v378_v45  ;;  %403 = vst.msk [vmem:[#allocation2] sm:$0xf] %vm401_vm3, %v378_v45  ;;  %386 = vperm.xlu0 %609, %v378_v45  }
 0x14f   : > { %v381_v57 = vmul.f32 1.442695, %v380_v46 }
 0x1bf   : > { %v387_v47 = vpop.permute.xlu0 %386 }
 0x1c0   : > { %v389_v48 = vsub.f32 %v354_v35, %v387_v47  ;;  %v390_v49 = vsub.f32 %v367_v36, %v387_v47 }
 0x1c2   : > { %v391_v50 = vmul.f32 1.442695, %v389_v48  ;;  %v393_v51 = vmul.f32 1.442695, %v390_v49 }
 0x1c4   : > { %610 = vpow2.f32 %v391_v50 }
 0x1c5   : > { %612 = vpow2.f32 %v393_v51 }
 0x1c6   : > { %614 = vpow2.f32 %v381_v57 }
 0x1ca   : > { %v611_v52 = vpop.eup %610 }
 0x1cb   : > { %v613_v53 = vpop.eup %612  ;;  %v395_v54 = vsel %vm372_vm2, %v611_v52, 0.0 }
 0x1cc   : > { %v396_v55 = vsel %vm372_vm2, %v613_v53, 0.0  ;;  %v615_v58 = vpop.eup %614 }
 0x1cd   : > { %v397_v56 = vadd.f32 %v396_v55, %v395_v54  ;;  %v383_v60 = vmul.f32 %v615_v58, %v379_v59 }
 0x1cf   : > { %398 = vadd.xlane.f32.xlu1 %v397_v56 }
 0x241   : > { %407 = sbr.rel (%p562_p6) target bundleno = 601 (0x259), region = 36 }
 0x242   : > { %v399_v61 = vpop.xlane.xlu1 %398 }
 0x243   : > { %v400_v62 = vadd.f32 %v399_v61, %v383_v60 }
 0x245   : > { %402 = vst.msk [vmem:[#allocation3] sm:$0xf] %vm401_vm3, %v400_v62 }
 0x246   : > { %v408_v1 = vld [vmem:[#allocation2] sm:$0xf] }
 0x24c   : > { %v409_v63 = vld [vmem:[#allocation3] sm:$0xf] }
 0x24d   : > { %616 = vlog2.f32 %v409_v63 }
 0x253   : > { %v617_v0 = vpop.eup %616 }
 0x254   : > { %v411_v2 = vmul.f32 0.6931472, %v617_v0 }
 0x256   : > { %v412_v3 = vadd.f32 %v411_v2, %v408_v1 }
 0x258   : > { %413 = vst.msk [vmem:[%s746_s2] sm:$0xf] %vm401_vm3, %v412_v3 }
 0x259 PF: > { %s12_s11 = sadd.s32 1, %s640_s11   ;;  %s747_s9 = smov %s636_s10 }
 0x25a   : > { %p9_p7 = scmp.ge.s32.totalorder %s12_s11, 6   ;;  %s748_s10 = smov %s750_s12 }
 0x25c   :  { %11 = sbr.rel (!%p9_p7) target bundleno = 2 (0x2), region = 69 }

</bundles_post_ra>
